<compile_context>
chip_gen: v7x
topology: tpu7x:2x2x1
jax: 0.10.0
libtpu: 0.0.40
codegen_flags: <defaults>
</compile_context>

<pallas_src>
import functools

import jax
import jax.numpy as jnp
from jax.experimental import pallas as pl
from jax.experimental.pallas import tpu as pltpu


# ----------------------------------------------------------------------------
# Kernel bodies: tiled matmul, per-tile cast to compute dtype, f32 accumulation,
# scaled epilogue on the last K step.
# ----------------------------------------------------------------------------
def _matmul_kernel_acc_in_out(a_ref, b_ref, o_ref, *, scale, compute_dtype):
    """out dtype == f32: accumulate straight into the resident output block."""
    k = pl.program_id(2)
    prod = jnp.dot(
        a_ref[...].astype(compute_dtype),
        b_ref[...].astype(compute_dtype),
        preferred_element_type=jnp.float32,
    )

    @pl.when(k == 0)
    def _():
        o_ref[...] = prod            # init with first product (skips memset)

    @pl.when(k > 0)
    def _():
        o_ref[...] += prod

    @pl.when(k == pl.num_programs(2) - 1)
    def _():
        if scale != 1.0:             # trace-time constant
            o_ref[...] = o_ref[...] * scale


def _matmul_kernel_scratch_acc(a_ref, b_ref, o_ref, acc_ref, *, scale, compute_dtype):
    """out dtype != f32: f32 scratch accumulator, fused scale+cast on last step."""
    k = pl.program_id(2)
    prod = jnp.dot(
        a_ref[...].astype(compute_dtype),
        b_ref[...].astype(compute_dtype),
        preferred_element_type=jnp.float32,
    )

    @pl.when(k == 0)
    def _():
        acc_ref[...] = prod

    @pl.when(k > 0)
    def _():
        acc_ref[...] += prod

    @pl.when(k == pl.num_programs(2) - 1)
    def _():
        acc = acc_ref[...]
        if scale != 1.0:
            acc = acc * scale
        o_ref[...] = acc.astype(o_ref.dtype)


# ----------------------------------------------------------------------------
# Host-side helpers
# ----------------------------------------------------------------------------
def _pick_tile(dim, want, align):
    """Largest legal tile <= want: full-extent block for small dims, else a
    multiple of `align` (block_shape must divide (8,128) or equal the dim)."""
    if dim <= want:
        return dim
    t = (want // align) * align
    return max(t, align)


def _round_up(x, m):
    return -(-x // m) * m


def _chip_config():
    """Generation-aware (tm, tn) targets and scoped-VMEM cap.

    Targets follow the HBM-vs-MXU balance point per generation:
      v5e  (~240 bf16-flops/B, 128 MiB VMEM)  -> tm=tn~768,  cap 96 MiB
      v6e  (~640-715,          128 MiB VMEM)  -> tm=tn~1536, cap 96 MiB
      v7x  (~311 per TC,        64 MiB VMEM)  -> tm=tn~1024, cap 48 MiB
    """
    kind = ""
    try:
        kind = jax.devices()[0].device_kind.lower()
    except Exception:
        pass
    if "v7" in kind:
        tm, tn, cap = 1024, 1024, 48 << 20
    elif "v6" in kind:
        tm, tn, cap = 1536, 1536, 96 << 20
    elif "v5" in kind:
        tm, tn, cap = 768, 768, 96 << 20
    else:  # unknown generation: conservative
        tm, tn, cap = 1024, 1024, 48 << 20
    try:
        phys = int(pltpu.get_tpu_info().vmem_capacity_bytes)
        cap = min(cap, max(phys - (16 << 20), phys // 2))
    except Exception:
        pass
    return tm, tn, cap


def scaled_matmul(a, b, *, scale=1.0, tm=None, tn=None, tk=512,
                  compute_dtype=jnp.bfloat16, out_dtype=None):
    """scale * (a @ b) via a Pallas TPU kernel.  a: (M, K), b: (K, N).

    Operands are cast to `compute_dtype` (bf16 by default — MXU-native rate);
    accumulation is f32.  Arbitrary M/N/K are supported (tiles are capped to the
    problem dims; padding only when a dim does not divide the chosen tile).
    """
    M, K = a.shape
    K2, N = b.shape
    assert K == K2, f"inner dims mismatch: {K} vs {K2}"
    out_dtype = jnp.dtype(out_dtype or a.dtype)
    compute_dtype = jnp.dtype(compute_dtype)

    tm_d, tn_d, vmem_cap = _chip_config()
    tm = tm or tm_d
    tn = tn or tn_d

    # Where does the compute-dtype cast happen?  Upfront cast costs one extra
    # HBM pass over A and B but lets the kernel stream bf16 (2x arithmetic
    # intensity) — only worth it when each operand is re-read many times by the
    # grid.  Otherwise cast per-tile inside the kernel (no extra HBM round trip).
    needs_cast = (a.dtype != compute_dtype) or (b.dtype != compute_dtype)
    reuse_a = pl.cdiv(N, tn)     # times A is streamed from HBM
    reuse_b = pl.cdiv(M, tm)     # times B is streamed from HBM
    upfront_cast = needs_cast and min(reuse_a, reuse_b) >= 4

    if upfront_cast:
        a_in, b_in = a.astype(compute_dtype), b.astype(compute_dtype)
    else:
        a_in, b_in = a, b
    a_bytes = a_in.dtype.itemsize
    b_bytes = b_in.dtype.itemsize
    out_bytes = out_dtype.itemsize
    use_scratch = out_dtype != jnp.float32   # f32 output accumulates in-place

    # Tile selection: full-extent blocks for small dims, otherwise multiples of
    # (8, 128).  When fitting VMEM, shrink tk first (it doesn't change per-step
    # intensity), then tm; keep tn large for lane-dense stores and long
    # contiguous B-row DMAs.
    tm_e = _pick_tile(M, tm, 8)
    tn_e = _pick_tile(N, tn, 128)
    tk_e = _pick_tile(K, tk, 128)

    def footprint(tm_, tn_, tk_):
        f = 2 * (tm_ * tk_ * a_bytes + tk_ * tn_ * b_bytes)  # dbl-buffered inputs
        f += 2 * tm_ * tn_ * out_bytes                        # dbl-buffered output
        if use_scratch:
            f += tm_ * tn_ * 4                                # f32 accumulator
        return f

    budget = vmem_cap - (8 << 20)                             # compiler headroom
    while footprint(tm_e, tn_e, tk_e) > budget:
        if tk_e > 256 and tk_e % 256 == 0:
            tk_e //= 2
        elif tm_e > 128 and tm_e % 16 == 0:
            tm_e //= 2
        elif tn_e > 256 and tn_e % 256 == 0:
            tn_e //= 2
        else:
            break

    # Megacore / v7x 2-TC: never emit a 1x1 (i, j) grid if it can be split.
    if pl.cdiv(M, tm_e) * pl.cdiv(N, tn_e) < 2:
        if tm_e >= 16 and tm_e % 16 == 0:
            tm_e //= 2
        elif tn_e >= 256 and tn_e % 256 == 0:
            tn_e //= 2

    # Zero-pad only when a dim does not divide the tile (no-op for aligned shapes).
    Mp, Kp, Np = _round_up(M, tm_e), _round_up(K, tk_e), _round_up(N, tn_e)
    if (Mp, Kp) != (M, K):
        a_in = jnp.pad(a_in, ((0, Mp - M), (0, Kp - K)))
    if (Kp, Np) != (K, N):
        b_in = jnp.pad(b_in, ((0, Kp - K), (0, Np - N)))

    grid = (Mp // tm_e, Np // tn_e, Kp // tk_e)

    # Advisory cost: A is streamed grid_j times, B grid_i times (no HBM reuse
    # across grid steps), plus one output write.
    cost = pl.CostEstimate(
        flops=2 * Mp * Np * Kp,
        transcendentals=0,
        bytes_accessed=(a_bytes * Mp * Kp * grid[1]
                        + b_bytes * Kp * Np * grid[0]
                        + out_bytes * Mp * Np),
    )

    vmem_limit = int(min(vmem_cap,
                         max(footprint(tm_e, tn_e, tk_e) + (8 << 20), 32 << 20)))

    kernel_kwargs = dict(scale=float(scale), compute_dtype=compute_dtype)
    if use_scratch:
        kernel = functools.partial(_matmul_kernel_scratch_acc, **kernel_kwargs)
        scratch_shapes = [pltpu.VMEM((tm_e, tn_e), jnp.float32)]
    else:
        kernel = functools.partial(_matmul_kernel_acc_in_out, **kernel_kwargs)
        scratch_shapes = []

    out = pl.pallas_call(
        kernel,
        out_shape=jax.ShapeDtypeStruct((Mp, Np), out_dtype),
        grid_spec=pltpu.PrefetchScalarGridSpec(
            num_scalar_prefetch=0,
            grid=grid,
            in_specs=[
                pl.BlockSpec((tm_e, tk_e), lambda i, j, k: (i, k)),
                pl.BlockSpec((tk_e, tn_e), lambda i, j, k: (k, j)),
            ],
            out_specs=pl.BlockSpec((tm_e, tn_e), lambda i, j, k: (i, j)),
            scratch_shapes=scratch_shapes,
        ),
        compiler_params=pltpu.CompilerParams(
            dimension_semantics=("parallel", "parallel", "arbitrary"),
            vmem_limit_bytes=vmem_limit,
        ),
        cost_estimate=cost,
    )(a_in, b_in)

    if (Mp, Np) != (M, N):
        out = out[:M, :N]
    return out


# ----------------------------------------------------------------------------
# JAX equivalent of the PyTorch FunctionModule: remap kwargs and call fun.
# ----------------------------------------------------------------------------
class FunctionModule:
    def __init__(self, fun, arg_names: dict, **kwargs):
        """
        :param fun: the function to call
        :param arg_names: maps fun's parameter names -> incoming kwarg names,
                          i.e. fun(**{k: kwargs[v] for k, v in arg_names.items()})
        :param kwargs: additional keyword args passed to every call
        """
        self.fun = fun
        self.arg_names = arg_names
        self.kwargs = kwargs

    def forward(self, **kwargs):
        # TODO(synk): `scale` is baked in at trace time (one compile per distinct
        # value) — fine here since FunctionModule kwargs are fixed at construction.
        return self.fun(
            **{k: kwargs[v] for k, v in self.arg_names.items()}, **self.kwargs
        )

    __call__ = forward


if __name__ == "__main__":
    key = jax.random.PRNGKey(0)
    ka, kb = jax.random.split(key)

    M, K, N = 128, 256, 128  # small shapes, aligned to (8, 128) tiling
    a = jax.random.normal(ka, (M, K), dtype=jnp.float32)
    b = jax.random.normal(kb, (K, N), dtype=jnp.float32)

    # forward(x=..., y=...) -> fun(a=x, b=y, scale=0.5)
    module = FunctionModule(scaled_matmul, arg_names={"a": "x", "b": "y"}, scale=0.5)

    out = module(x=a, y=b)
    out = jax.block_until_ready(out)

    # Correctness check: reference with the same bf16-operand / f32-accumulate
    # numerics the kernel uses.
    ref = 0.5 * jnp.dot(
        a.astype(jnp.bfloat16), b.astype(jnp.bfloat16),
        preferred_element_type=jnp.float32,
    ).astype(jnp.float32)
    assert out.shape == (M, N)
    assert out.dtype == a.dtype
    assert jnp.allclose(out.astype(jnp.float32), ref, atol=1e-2, rtol=1e-2), \
        "mismatch vs reference"

    print("KERNEL_OK")
</pallas_src>

<mosaic_0001>
module attributes {stable_mosaic.version = 11 : i64} {
  func.func @_matmul_kernel_acc_in_out(%arg0: i32, %arg1: i32, %arg2: i32, %arg3: memref<64x256xf32, #tpu.memory_space<vmem>>, %arg4: memref<256x128xf32, #tpu.memory_space<vmem>>, %arg5: memref<64x128xf32, #tpu.memory_space<vmem>>) attributes {dimension_semantics = [#tpu.dimension_semantics<parallel>, #tpu.dimension_semantics<parallel>, #tpu.dimension_semantics<arbitrary>], iteration_bounds = array<i64: 2, 1, 1>, scalar_prefetch = 0 : i64, scratch_operands = 0 : i64, tpu.core_type = #tpu.core_type<tc>, window_params = [{transform_indices = @transform_0, window_bounds = array<i64: 64, 256>}, {transform_indices = @transform_1, window_bounds = array<i64: 256, 128>}, {transform_indices = @transform_2, window_bounds = array<i64: 64, 128>}]} {
    %c0 = arith.constant 0 : index
    %c0_0 = arith.constant 0 : index
    %0 = vector.load %arg3[%c0, %c0_0] : memref<64x256xf32, #tpu.memory_space<vmem>>, vector<64x256xf32>
    %1 = arith.truncf %0 : vector<64x256xf32> to vector<64x256xbf16>
    %c0_1 = arith.constant 0 : index
    %c0_2 = arith.constant 0 : index
    %2 = vector.load %arg4[%c0_1, %c0_2] : memref<256x128xf32, #tpu.memory_space<vmem>>, vector<256x128xf32>
    %3 = arith.truncf %2 : vector<256x128xf32> to vector<256x128xbf16>
    %cst = arith.constant dense<0.000000e+00> : vector<64x128xf32>
    %4 = tpu.matmul %1, %3, %cst {dimension_numbers = #tpu.dot_dimension_numbers<[1], [0], [0], [1], [0, 0, 1, 1], [], []>} : vector<64x256xbf16>, vector<256x128xbf16>, vector<64x128xf32> -> vector<64x128xf32>
    %c0_i32 = arith.constant 0 : i32
    %5 = arith.cmpi eq, %arg2, %c0_i32 : i32
    %6 = arith.extui %5 : i1 to i32
    %c0_i32_3 = arith.constant 0 : i32
    %7 = arith.cmpi ne, %6, %c0_i32_3 : i32
    scf.if %7 {
      %c0_8 = arith.constant 0 : index
      %c0_9 = arith.constant 0 : index
      %14 = vector.load %arg5[%c0_8, %c0_9] : memref<64x128xf32, #tpu.memory_space<vmem>>, vector<64x128xf32>
      tpu.vector_store %arg5[%c0_8, %c0_9], %4 {strides = array<i32>} : memref<64x128xf32, #tpu.memory_space<vmem>>, vector<64x128xf32>,
    } else {
    }
    %c0_i32_4 = arith.constant 0 : i32
    %8 = arith.cmpi sgt, %arg2, %c0_i32_4 : i32
    %9 = arith.extui %8 : i1 to i32
    %c0_i32_5 = arith.constant 0 : i32
    %10 = arith.cmpi ne, %9, %c0_i32_5 : i32
    scf.if %10 {
      %c0_8 = arith.constant 0 : index
      %c0_9 = arith.constant 0 : index
      %14 = vector.load %arg5[%c0_8, %c0_9] : memref<64x128xf32, #tpu.memory_space<vmem>>, vector<64x128xf32>
      %15 = arith.addf %14, %4 : vector<64x128xf32>
      %c0_10 = arith.constant 0 : index
      %c0_11 = arith.constant 0 : index
      %16 = vector.load %arg5[%c0_10, %c0_11] : memref<64x128xf32, #tpu.memory_space<vmem>>, vector<64x128xf32>
      tpu.vector_store %arg5[%c0_10, %c0_11], %15 {strides = array<i32>} : memref<64x128xf32, #tpu.memory_space<vmem>>, vector<64x128xf32>,
    } else {
    }
    %c0_i32_6 = arith.constant 0 : i32
    %11 = arith.cmpi eq, %arg2, %c0_i32_6 : i32
    %12 = arith.extui %11 : i1 to i32
    %c0_i32_7 = arith.constant 0 : i32
    %13 = arith.cmpi ne, %12, %c0_i32_7 : i32
    scf.if %13 {
      %c0_8 = arith.constant 0 : index
      %c0_9 = arith.constant 0 : index
      %14 = vector.load %arg5[%c0_8, %c0_9] : memref<64x128xf32, #tpu.memory_space<vmem>>, vector<64x128xf32>
      %cst_10 = arith.constant 5.000000e-01 : f32
      %15 = vector.broadcast %cst_10 : f32 to vector<64x128xf32>
      %16 = arith.mulf %14, %15 : vector<64x128xf32>
      %c0_11 = arith.constant 0 : index
      %c0_12 = arith.constant 0 : index
      %17 = vector.load %arg5[%c0_11, %c0_12] : memref<64x128xf32, #tpu.memory_space<vmem>>, vector<64x128xf32>
      tpu.vector_store %arg5[%c0_11, %c0_12], %16 {strides = array<i32>} : memref<64x128xf32, #tpu.memory_space<vmem>>, vector<64x128xf32>,
    } else {
    }
    return
  }
  func.func @transform_0(%arg0: i32, %arg1: i32, %arg2: i32) -> (i32, i32) {
    %c0_i32 = arith.constant 0 : i32
    return %arg0, %arg2 : i32, i32
  }
  func.func @transform_1(%arg0: i32, %arg1: i32, %arg2: i32) -> (i32, i32) {
    %c0_i32 = arith.constant 0 : i32
    return %arg2, %arg1 : i32, i32
  }
  func.func @transform_2(%arg0: i32, %arg1: i32, %arg2: i32) -> (i32, i32) {
    %c0_i32 = arith.constant 0 : i32
    return %arg0, %arg1 : i32, i32
  }
}

</mosaic_0001>

<bundles_post_ra>
// kernel: tpu_custom_call.1
= control target key start
LH: loop header
LB: loop body
LE: loop exit
PB: predicated region body
PF: predicated region fallthrough
CT: control target
= control target key end

     0   :  { %7 = vsyncpa [#allocation3], 0  ;;  %s1105_s0 = inlined_call_operand.hbm [shape: f32[128,256], index: 0, kind: input, shape index: {}]   ;;  %s1106_s1 = inlined_call_operand.hbm [shape: f32[256,128], index: 1, kind: input, shape index: {}]   ;;  %s1107_s2 = inlined_call_operand.hbm [shape: f32[128,128], index: 2, kind: output, shape index: {}]  }
   0x1   :  { %9 = vsyncpa [#allocation3 + $0x1], 0 }
   0x2   :  { %10 = vsyncpa [#allocation6], 0 }
   0x3   :  { %11 = vsyncpa [#allocation4], 0 }
   0x4   :  { %13 = vsyncpa [#allocation4 + $0x1], 0  ;;  %s867_s9 = smov 0   ;;  %s869_s10 = smov 0  }
   0x5   :  { %s871_s11 = smov 0   ;;  %s873_s12 = smov 0  }
   0x6   :  { %s875_s13 = smov 0   ;;  %s877_s14 = smov 0  }
   0x7 LB: > { %s541_s15 = sadd.s32 4294967295, %s841_s14   ;;  %s542_s16 = sadd.s32 4294967294, %s841_s14   ;;  %s841_s14 = sphi %s877_s14, %s19_s14   ;;  %s837_s13 = sphi %s875_s13, %s1131_s13   ;;  %s833_s12 = sphi %s873_s12, %s1130_s12   ;;  %s829_s11 = sphi %s871_s11, %s1129_s11   ;;  %s825_s10 = sphi %s869_s10, %s1128_s10   ;;  %s821_s9 = sphi %s867_s9, %s1127_s9  }
   0x8   : > { %p60_p0 = scmp.ne.s32.totalorder %s825_s10, %s821_s9  ;;  %p901_p1 = scmp.eq.s32.totalorder %s541_s15, 0 }
   0x9   : > { %p905_p2 = scmp.eq.s32.totalorder %s541_s15, 1  ;;  %p120_p3 = scmp.eq.s32.totalorder %s542_s16, 1 }
   0xa   : > { %s1112_s17 = scalar_select %p901_p1, 1, 0 }
   0xb   : > { %s1113_s18 = scalar_select %p905_p2, 1, 0 }
   0xc   : > { %p911_p4 = por %p901_p1, %p60_p0  ;;  %p543_p5 = scmp.ge.s32.totalorder %s841_s14, 1 }
   0xd   : > { %p916_p6 = por %p120_p3, %p60_p0  ;;  %p127_p7 = scmp.lt.s32.totalorder %s841_s14, 3 }
   0xe   : > { %s1114_s19 = scalar_select %p911_p4, 1, 0 }
   0xf   : > { %s1115_s20 = scalar_select %p916_p6, 1, 0 }
  0x10   : > { %p921_p8 = pnand %p543_p5, %p127_p7  ;;  %s843_s22 = smov [#allocation5]  }
  0x11   : > { %s143_s23 = sshll.u32 %s843_s22, 4  ;;  %s38_s25 = sadd.s32 1, %s837_s13  ;;  %s144_s23 = int_to_ptr.vmem [resolvable:$true] %s143_s23 }
  0x12   : > { %s1116_s21 = scalar_select %p921_p8, 1, 0 }
  0x13   : > { %p626_p9 = pneg %p921_p8  ;;  %s697_s28 = scalar_lea.hbm %s1106_s1, 4096 }
  0x14   : > { %p698_p12 = scmp.ne.s32.totalorder %s1106_s1, %s697_s28  ;;  %p704_p5 = scmp.lt.u32.totalorder %s697_s28, %s1106_s1 }
  0x15   : > { %p930_p11 = pnand %p626_p9, %p901_p1 }
  0x17   : > { %p699_p13 = pneg %p930_p11 }
  0x19   : > { %p700_p0 = pnand %p699_p13, %p698_p12 }
  0x1b   : > { %p701_p3 = pneg %p700_p0 }
  0x1d   : > { %p706_p7 = pnand %p704_p5, %p701_p3 }
  0x1f   : > { %709 = shalt.err (!%p706_p7)
}
  0x20   : > { %s710_s5 = scalar_lea.vmem %s144_s23, 4096  ;;  %p718_p1 = scmp.lt.s32.totalorder %s144_s23, %s144_s23 }
  0x21   : > { %p711_p9 = scmp.ne.s32.totalorder %s144_s23, %s710_s5  ;;  %p719_p4 = scmp.lt.s32.totalorder %s710_s5, %s710_s5 }
  0x23   : > { %p713_p10 = pnand %p711_p9, %p699_p13  ;;  %p720_p8 = por %p719_p4, %p718_p1 }
  0x25   : > { %p714_p6 = pneg %p713_p10 }
  0x27   : > { %p721_p2 = pnand %p720_p8, %p714_p6 }
  0x29   : > { %724 = shalt.err (!%p721_p2)
}
  0x2a   : > { %s844_s6 = smov 128   ;;  %s845_s7 = smov 8  }
  0x2b   : > { %629 = dma.hbm_to_vmem [thread:$0]  (!%p930_p11), %s1106_s1, 4096, %s144_s23, [#allocation6], %s844_s6, %s844_s6, %s845_s7  }
  0x2c   : > { %p40_p1 = scmp.ge.s32.totalorder %s38_s25, 2  ;;  %s47_s16 = sadd.s32 1, %s829_s11 }
  0x2d   : > { %p54_p2 = scmp.ne.s32.totalorder %s829_s11, %s825_s10  ;;  %p55_p4 = scmp.eq.s32.totalorder %s841_s14, 0 }
  0x2e   : > { %s1133_s25 = smov (%p40_p1, %s38_s25), 0  ;;  %p1119_p8 = scmp.ne.s32.totalorder %s1113_s18, 0 }
  0x2f   : > { %p957_p6 = por %p55_p4, %p54_p2  ;;  %s42_s24 = ssub.s32 %s837_s13, %s1133_s25 }
  0x30   : > { %p963_p10 = por %p1119_p8, %p54_p2  ;;  %p639_p12 = scmp.lt.s32.totalorder %s841_s14, 2 }
  0x31   : > { %p45_p11 = scmp.eq.s32.totalorder %s42_s24, 0  ;;  %s157_s23 = sand.u32 1, %s829_s11  }
  0x32   : > { %s546_s27 = sshll.u32 %s157_s23, 7  ;;  %s560_s29 = sshll.u32 %s837_s13, 11 }
  0x33   : > { %s972_s28 = scalar_select %p45_p11, %s829_s11, %s47_s16  }
  0x34   : > { %s978_s4 = scalar_lea.hbm %s1105_s0, %s560_s29  ;;  %s161_s18 = scalar_lea.vmem [#allocation2], %s546_s27 }
  0x35   : > { %s171_s5 = sshll.u32 %s161_s18, 4  ;;  %p984_p13 = pnand %p639_p12, %p957_p6  ;;  %s980_s5 = int_to_ptr.vmem [resolvable:$true] %s171_s5 }
  0x36   : > { %s988_s7 = scalar_lea.sflag [#allocation3], %s157_s23  ;;  %s725_s8 = scalar_lea.hbm %s978_s4, 2048 }
  0x37   : > { %p726_p0 = scmp.ne.s32.totalorder %s978_s4, %s725_s8  ;;  %p727_p3 = pneg %p984_p13 }
  0x38   : > { %s730_s22 = scalar_lea.hbm %s1105_s0, 4096  ;;  %p731_p9 = scmp.lt.u32.totalorder %s978_s4, %s1105_s0 }
  0x39   : > { %p728_p5 = pnand %p727_p3, %p726_p0  ;;  %p732_p1 = scmp.lt.u32.totalorder %s730_s22, %s725_s8 }
  0x3a   : > { %p734_p4 = scmp.lt.u32.totalorder %s725_s8, %s978_s4 }
  0x3b   : > { %p729_p7 = pneg %p728_p5  ;;  %p733_p2 = por %p732_p1, %p731_p9 }
  0x3d   : > { %p735_p6 = por %p734_p4, %p733_p2 }
  0x3f   : > { %p736_p8 = pnand %p735_p6, %p729_p7 }
  0x41   : > { %739 = shalt.err (!%p736_p8)
}
  0x42   : > { %s740_s23 = scalar_lea.vmem %s980_s5, 2048  ;;  %s846_s29 = smov [#allocation2]  }
  0x43   : > { %p741_p12 = scmp.ne.s32.totalorder %s980_s5, %s740_s23  ;;  %s745_s30 = sshll.u32 %s846_s29, 4  ;;  %s746_s30 = int_to_ptr.vmem [resolvable:$false] %s745_s30 }
  0x44   : > { %s747_s3 = scalar_lea.vmem %s746_s30, 4096  ;;  %p748_p5 = scmp.lt.s32.totalorder %s980_s5, %s746_s30 }
  0x45   : > { %p743_p11 = pnand %p741_p12, %p727_p3  ;;  %p749_p9 = scmp.lt.s32.totalorder %s747_s3, %s740_s23 }
  0x47   : > { %p744_p0 = pneg %p743_p11  ;;  %p750_p1 = por %p749_p9, %p748_p5 }
  0x49   : > { %p751_p2 = pnand %p750_p1, %p744_p0 }
  0x4b   : > { %754 = shalt.err (!%p751_p2)
}
  0x4c   : > { %s847_s18 = smov 256   ;;  %s848_s8 = smov 16  }
  0x4d   : > { %633 = dma.hbm_to_vmem [thread:$0]  (!%p984_p13), %s978_s4, 2048, %s980_s5, %s988_s7, %s847_s18, %s847_s18, %s848_s8  }
  0x4e   : > { %p1122_p3 = scmp.ne.s32.totalorder %s1116_s21, 0 }
  0x4f   : > { %s1019_s15 = sand.u32 (!%p1122_p3), 1, %s825_s10   ;;  %p1123_p7 = scmp.ne.s32.totalorder (!%p1122_p3), %s1114_s19, 0 }
  0x50   : > { %183 = sbr.rel (%p1122_p3) target bundleno = 368 (0x170), region = 28  ;;  %s551_s16 = sshll.u32 (!%p1122_p3), %s1019_s15, 7 }
  0x51   : > { %s186_s22 = scalar_lea.sflag (!%p1122_p3), [#allocation3], %s1019_s15  ;;  %s1023_s24 = scalar_lea.vmem (!%p1122_p3), [#allocation2], %s551_s16 }
  0x57   : > { %808 = dma.done.wait (%p1123_p7), %s186_s22, 2048  }
  0x58   : > { %810 = vsyncadd (%p1123_p7), %s186_s22, 4294965248  ;;  %p1124_p13 = scmp.ne.s32.totalorder %s1112_s17, 0 }
  0x5a   : > { %812 = dma.done.wait (%p1124_p13), [#allocation6], 4096  }
  0x5b   : > { %814 = vsyncadd (%p1124_p13), [#allocation6], 4294963200  ;;  %v259_v0 = vld [vmem:[#allocation5 + $0x80] sm:$0xff]  ;;  %v260_v1 = vld [vmem:[#allocation5 + $0x88] sm:$0xff]  ;;  %s553_s17 = sshll.u32 %s1019_s15, 6  ;;  %s561_s21 = sshll.u32 %s833_s12, 10 }
  0x5c   : > { %v243_v2 = vld [vmem:[#allocation5] sm:$0xff]  ;;  %v283_v3 = vpack.c.bf16 %v260_v1, %v259_v0  ;;  %v244_v4 = vld [vmem:[#allocation5 + $0x8] sm:$0xff]  ;;  %v261_v5 = vld [vmem:[#allocation5 + $0x90] sm:$0xff]  ;;  %s213_s19 = scalar_lea.vmem [#allocation7], %s553_s17  ;;  %s1054_s7 = scalar_lea.hbm %s1107_s2, %s561_s21 }
  0x5d   : > { %v262_v6 = vld [vmem:[#allocation5 + $0x98] sm:$0xff]  ;;  %v275_v7 = vpack.c.bf16 %v244_v4, %v243_v2  ;;  %v245_v9 = vld [vmem:[#allocation5 + $0x10] sm:$0xff]  ;;  %v263_v11 = vld [vmem:[#allocation5 + $0xa0] sm:$0xff]  ;;  %s438_s4 = sshll.u32 %s213_s19, 4  ;;  %s424_s12 = scalar_lea.sflag [#allocation4], %s1019_s15  ;;  %s1056_s4 = int_to_ptr.vmem [resolvable:$true] %s438_s4 }
  0x5e   : > { %v284_v8 = vpack.c.bf16 %v262_v6, %v261_v5  ;;  %v246_v10 = vld [vmem:[#allocation5 + $0x18] sm:$0xff]  ;;  %562 = vmatprep.subr.bf16.mxu0 %v283_v3  ;;  %602 = vmatprep.subr.bf16.mxu1 %v283_v3  ;;  %v264_v12 = vld [vmem:[#allocation5 + $0xa8] sm:$0xff]  ;;  %v247_v15 = vld [vmem:[#allocation5 + $0x20] sm:$0xff]  ;;  %s755_s27 = scalar_lea.vmem %s1056_s4, 1024  ;;  %s849_s23 = smov [#allocation7]  }
  0x5f   : > { %563 = vmatpush3.bf16.msra.mxu0 %v275_v7  ;;  %610 = vmatpush3.bf16.msra.mxu1 %v275_v7  ;;  %v276_v13 = vpack.c.bf16 %v246_v10, %v245_v9  ;;  %v285_v14 = vpack.c.bf16 %v264_v12, %v263_v11  ;;  %v248_v16 = vld [vmem:[#allocation5 + $0x28] sm:$0xff]  ;;  %v265_v17 = vld [vmem:[#allocation5 + $0xb0] sm:$0xff]  ;;  %v266_v18 = vld [vmem:[#allocation5 + $0xb8] sm:$0xff]  ;;  %p756_p4 = scmp.ne.s32.totalorder %s1056_s4, %s755_s27  ;;  %s759_s29 = sshll.u32 %s849_s23, 4  ;;  %s760_s29 = int_to_ptr.vmem [resolvable:$false] %s759_s29 }
  0x60   : > { %564 = vmatprep.subr.bf16.mxu0 %v284_v8  ;;  %603 = vmatprep.subr.bf16.mxu1 %v284_v8  ;;  %v277_v19 = vpack.c.bf16 %v248_v16, %v247_v15  ;;  %v286_v20 = vpack.c.bf16 %v266_v18, %v265_v17  ;;  %v249_v21 = vld [vmem:[#allocation5 + $0x30] sm:$0xff]  ;;  %v250_v22 = vld [vmem:[#allocation5 + $0x38] sm:$0xff]  ;;  %v267_v23 = vld [vmem:[#allocation5 + $0xc0] sm:$0xff]  ;;  %s761_s30 = scalar_lea.vmem %s760_s29, 2048  ;;  %p762_p12 = scmp.lt.s32.totalorder %s1056_s4, %s760_s29 }
  0x61   : > { %v268_v24 = vld [vmem:[#allocation5 + $0xc8] sm:$0xff]  ;;  %v222_v26 = vld [vmem:[%s1023_s24 + $0x18] sm:$0xff]  ;;  %v278_v29 = vpack.c.bf16 %v250_v22, %v249_v21  ;;  %v251_v33 = vld [vmem:[#allocation5 + $0x40] sm:$0xff]  ;;  %p757_p6 = pnand %p756_p4, %p963_p10  ;;  %p763_p11 = scmp.lt.s32.totalorder %s761_s30, %s755_s27 }
  0x62   : > { %v220_v25 = vld [vmem:[%s1023_s24 + $0x8] sm:$0xff]  ;;  %v230_v28 = vld [vmem:[%s1023_s24 + $0x58] sm:$0xff]  ;;  %v287_v32 = vpack.c.bf16 %v268_v24, %v267_v23  ;;  %v269_v35 = vld [vmem:[#allocation5 + $0xd0] sm:$0xff] }
  0x63   : > { %565 = vmatpush3.bf16.msra.mxu0 %v276_v13  ;;  %611 = vmatpush3.bf16.msra.mxu1 %v276_v13  ;;  %v228_v27 = vld [vmem:[%s1023_s24 + $0x48] sm:$0xff]  ;;  %v236_v30 = vpack.c.bf16 %v222_v26, %v220_v25  ;;  %v270_v36 = vld [vmem:[#allocation5 + $0xd8] sm:$0xff]  ;;  %v253_v39 = vld [vmem:[#allocation5 + $0x50] sm:$0xff]  ;;  %p758_p8 = pneg %p757_p6  ;;  %p764_p0 = por %p763_p11, %p762_p12 }
  0x64   : > { %566 = vmatprep.subr.bf16.mxu0 %v285_v14  ;;  %604 = vmatprep.subr.bf16.mxu1 %v285_v14  ;;  %v240_v31 = vpack.c.bf16 %v230_v28, %v228_v27  ;;  %v252_v34 = vld [vmem:[#allocation5 + $0x48] sm:$0xff]  ;;  %v288_v38 = vpack.c.bf16 %v270_v36, %v269_v35  ;;  %v254_v40 = vld [vmem:[#allocation5 + $0x58] sm:$0xff]  ;;  %v271_v41 = vld [vmem:[#allocation5 + $0xe0] sm:$0xff] }
  0x65   : > { %323 = vmatprep.mubr.bf16.mxu0 %v236_v30  ;;  %v279_v37 = vpack.c.bf16 %v252_v34, %v251_v33  ;;  %v272_v42 = vld [vmem:[#allocation5 + $0xe8] sm:$0xff]  ;;  %v280_v43 = vpack.c.bf16 %v254_v40, %v253_v39  ;;  %v255_v45 = vld [vmem:[#allocation5 + $0x60] sm:$0xff]  ;;  %v273_v47 = vld [vmem:[#allocation5 + $0xf0] sm:$0xff]  ;;  %p765_p5 = pnand %p764_p0, %p758_p8 }
  0x66   : > { %339 = vmatprep.mubr.bf16.mxu1 %v240_v31  ;;  %v289_v44 = vpack.c.bf16 %v272_v42, %v271_v41  ;;  %v256_v46 = vld [vmem:[#allocation5 + $0x68] sm:$0xff]  ;;  %v274_v48 = vld [vmem:[#allocation5 + $0xf8] sm:$0xff]  ;;  %v257_v51 = vld [vmem:[#allocation5 + $0x70] sm:$0xff] }
  0x67   : > { %567 = vmatpush3.bf16.msra.mxu0 %v277_v19  ;;  %612 = vmatpush3.bf16.msra.mxu1 %v277_v19  ;;  %v281_v49 = vpack.c.bf16 %v256_v46, %v255_v45  ;;  %v290_v50 = vpack.c.bf16 %v274_v48, %v273_v47  ;;  %v258_v52 = vld [vmem:[#allocation5 + $0x78] sm:$0xff]  ;;  %v219_v53 = vld [vmem:[%s1023_s24] sm:$0xff]  ;;  %v221_v54 = vld [vmem:[%s1023_s24 + $0x10] sm:$0xff] }
  0x68   : > { %568 = vmatprep.subr.bf16.mxu0 %v286_v20  ;;  %605 = vmatprep.subr.bf16.mxu1 %v286_v20  ;;  %v282_v55 = vpack.c.bf16 %v258_v52, %v257_v51  ;;  %v227_v56 = vld [vmem:[%s1023_s24 + $0x40] sm:$0xff]  ;;  %v229_v57 = vld [vmem:[%s1023_s24 + $0x50] sm:$0xff]  ;;  %v224_v58 = vld [vmem:[%s1023_s24 + $0x28] sm:$0xff]  ;;  %v235_v62 = vpack.c.bf16 %v221_v54, %v219_v53 }
  0x69   : > { %v226_v59 = vld [vmem:[%s1023_s24 + $0x38] sm:$0xff]  ;;  %v232_v60 = vld [vmem:[%s1023_s24 + $0x68] sm:$0xff]  ;;  %v239_v63 = vpack.c.bf16 %v229_v57, %v227_v56  ;;  %v223_v2 = vld [vmem:[%s1023_s24 + $0x20] sm:$0xff] }
  0x6a   : > { %v234_v61 = vld [vmem:[%s1023_s24 + $0x78] sm:$0xff]  ;;  %v238_v0 = vpack.c.bf16 %v226_v59, %v224_v58  ;;  %v225_v3 = vld [vmem:[%s1023_s24 + $0x30] sm:$0xff]  ;;  %v231_v4 = vld [vmem:[%s1023_s24 + $0x60] sm:$0xff] }
  0x6b   : > { %569 = vmatpush3.bf16.msra.mxu0 %v278_v29  ;;  %613 = vmatpush3.bf16.msra.mxu1 %v278_v29  ;;  %v242_v1 = vpack.c.bf16 %v234_v61, %v232_v60  ;;  %v233_v5 = vld [vmem:[%s1023_s24 + $0x70] sm:$0xff]  ;;  %v237_v6 = vpack.c.bf16 %v225_v3, %v223_v2 }
  0x6c   : > { %570 = vmatprep.subr.bf16.mxu0 %v287_v32  ;;  %606 = vmatprep.subr.bf16.mxu1 %v287_v32  ;;  %v241_v7 = vpack.c.bf16 %v233_v5, %v231_v4 }
  0x6f   : > { %571 = vmatpush3.bf16.msra.mxu0 %v279_v37  ;;  %614 = vmatpush3.bf16.msra.mxu1 %v279_v37 }
  0x70   : > { %572 = vmatprep.subr.bf16.mxu0 %v288_v38  ;;  %607 = vmatprep.subr.bf16.mxu1 %v288_v38 }
  0x73   : > { %573 = vmatpush3.bf16.msra.mxu0 %v280_v43  ;;  %615 = vmatpush3.bf16.msra.mxu1 %v280_v43 }
  0x74   : > { %574 = vmatprep.subr.bf16.mxu0 %v289_v44  ;;  %608 = vmatprep.subr.bf16.mxu1 %v289_v44 }
  0x77   : > { %575 = vmatpush3.bf16.msra.mxu0 %v281_v49  ;;  %616 = vmatpush3.bf16.msra.mxu1 %v281_v49 }
  0x78   : > { %576 = vmatprep.subr.bf16.mxu0 %v290_v50  ;;  %609 = vmatprep.subr.bf16.mxu1 %v290_v50 }
  0x7b   : > { %577 = vmatpush3.bf16.msra.mxu0 %v282_v55  ;;  %617 = vmatpush3.bf16.msra.mxu1 %v282_v55 }
  0x7e   : > { %324 = vmatmul.mubr.bf16.vlgmr.msra.gmra.mrb[0].mxu0 %v235_v62  ;;  %340 = vmatmul.mubr.bf16.vlgmr.msra.gmra.mrb[0].mxu1 %v239_v63 }
  0x7f   : > { %331 = vmatprep.mubr.bf16.mxu0 %v238_v0  ;;  %347 = vmatprep.mubr.bf16.mxu1 %v242_v1 }
  0x86   : > { %332 = vmatmul.mubr.bf16.gmra.mrb[4].mxu0 %v237_v6  ;;  %348 = vmatmul.mubr.bf16.gmra.mrb[4].mxu1 %v241_v7 }
 0x151   : > { %v578_v8 = vpop.f32.mrb[0].mxu0  ;;  %v590_v9 = vpop.f32.mrb[0].mxu1 }
 0x152   : > { %v579_v10 = vpop.f32.mrb[1].mxu0  ;;  %v591_v11 = vpop.f32.mrb[1].mxu1 }
 0x153   : > { %v580_v12 = vadd.f32 %v579_v10, %v578_v8  ;;  %v592_v13 = vadd.f32 %v591_v11, %v590_v9  ;;  %v581_v14 = vpop.f32.mrb[2].mxu0  ;;  %v593_v15 = vpop.f32.mrb[2].mxu1 }
 0x154   : > { %v582_v16 = vpop.f32.mrb[3].mxu0  ;;  %v594_v17 = vpop.f32.mrb[3].mxu1 }
 0x155   : > { %v407_v18 = vmul.f32 0.5, %v580_v12  ;;  %v411_v19 = vmul.f32 0.5, %v592_v13  ;;  %v583_v20 = vadd.f32 %v582_v16, %v581_v14  ;;  %v595_v21 = vadd.f32 %v594_v17, %v593_v15 }
 0x157   : > { %415 = vst [vmem:[%s213_s19] sm:$0xff] %v407_v18  ;;  %419 = vst [vmem:[%s213_s19 + $0x20] sm:$0xff] %v411_v19  ;;  %v408_v22 = vmul.f32 0.5, %v583_v20  ;;  %v412_v23 = vmul.f32 0.5, %v595_v21 }
 0x159   : > { %416 = vst [vmem:[%s213_s19 + $0x8] sm:$0xff] %v408_v22  ;;  %420 = vst [vmem:[%s213_s19 + $0x28] sm:$0xff] %v412_v23  ;;  %v584_v24 = vpop.f32.mrb[4].mxu0  ;;  %v596_v25 = vpop.f32.mrb[4].mxu1 }
 0x15a   : > { %v585_v26 = vpop.f32.mrb[5].mxu0  ;;  %v597_v27 = vpop.f32.mrb[5].mxu1 }
 0x15b   : > { %v586_v28 = vadd.f32 %v585_v26, %v584_v24  ;;  %v598_v29 = vadd.f32 %v597_v27, %v596_v25  ;;  %v587_v30 = vpop.f32.mrb[6].mxu0  ;;  %v599_v31 = vpop.f32.mrb[6].mxu1 }
 0x15c   : > { %v588_v32 = vpop.f32.mrb[7].mxu0  ;;  %v600_v33 = vpop.f32.mrb[7].mxu1 }
 0x15d   : > { %v409_v34 = vmul.f32 0.5, %v586_v28  ;;  %v413_v35 = vmul.f32 0.5, %v598_v29  ;;  %v589_v36 = vadd.f32 %v588_v32, %v587_v30  ;;  %v601_v37 = vadd.f32 %v600_v33, %v599_v31 }
 0x15f   : > { %417 = vst [vmem:[%s213_s19 + $0x10] sm:$0xff] %v409_v34  ;;  %421 = vst [vmem:[%s213_s19 + $0x30] sm:$0xff] %v413_v35  ;;  %v410_v38 = vmul.f32 0.5, %v589_v36  ;;  %v414_v39 = vmul.f32 0.5, %v601_v37 }
 0x161   : > { %418 = vst [vmem:[%s213_s19 + $0x18] sm:$0xff] %v410_v38  ;;  %422 = vst [vmem:[%s213_s19 + $0x38] sm:$0xff] %v414_v39 }
 0x162   : > { %768 = shalt.err (!%p765_p5)
}
 0x163   : > { %s769_s3 = scalar_lea.hbm %s1054_s7, 1024  ;;  %s773_s16 = scalar_lea.hbm %s1107_s2, 2048 }
 0x164   : > { %p770_p9 = scmp.ne.s32.totalorder %s1054_s7, %s769_s3  ;;  %p774_p3 = scmp.lt.u32.totalorder %s1054_s7, %s1107_s2 }
 0x165   : > { %p775_p7 = scmp.lt.u32.totalorder %s773_s16, %s769_s3  ;;  %p777_p4 = scmp.lt.u32.totalorder %s769_s3, %s1054_s7 }
 0x166   : > { %p771_p1 = pnand %p770_p9, %p963_p10 }
 0x167   : > { %p776_p13 = por %p775_p7, %p774_p3 }
 0x168   : > { %p772_p2 = pneg %p771_p1 }
 0x169   : > { %p778_p6 = por %p777_p4, %p776_p13 }
 0x16b   : > { %p779_p8 = pnand %p778_p6, %p772_p2 }
 0x16d   : > { %782 = shalt.err (!%p779_p8)
}
 0x16e   : > { %s850_s17 = smov 128   ;;  %s851_s19 = smov 8  }
 0x16f   : > { %624 = dma.vmem_to_hbm [thread:$0]  (%p963_p10), %s1056_s4, 1024, %s1054_s7, %s424_s12, %s850_s17, %s850_s17, %s851_s19  }
 0x170 PF: > { %s453_s21 = sand.u32 1, %s821_s9   ;;  %p1125_p12 = scmp.ne.s32.totalorder %s1115_s20, 0 }
 0x171   : > { %p1126_p11 = scmp.ge.s32.totalorder %s841_s14, 2  ;;  %s454_s5 = scalar_lea.sflag [#allocation4], %s453_s21 }
 0x173   : > { %p635_p0 = pnand %p1126_p11, %p1125_p12 }
 0x175   : > { %816 = dma.done.wait (!%p635_p0), %s454_s5, 1024  }
 0x176   : > { %818 = vsyncadd (!%p635_p0), %s454_s5, 4294966272  ;;  %s19_s14 = sadd.s32 1, %s841_s14   ;;  %s1127_s9 = smov %s825_s10 }
 0x177   : > { %p16_p5 = scmp.ge.s32.totalorder %s19_s14, 4   ;;  %s1128_s10 = smov %s829_s11 }
 0x178   : > { %s1129_s11 = smov %s972_s28  ;;  %s1130_s12 = smov %s837_s13 }
 0x179   : > { %s1131_s13 = smov %s1133_s25  ;;  %18 = sbr.rel (!%p16_p5) target bundleno = 7 (0x7), region = 90 }
 0x180   :  { %459 = vsyncpa [#allocation3], 1 }
 0x181   :  { %461 = vsyncpa [#allocation3 + $0x1], 1 }
 0x182   :  { %462 = vsyncpa [#allocation6], 1 }
 0x183   :  { %463 = vsyncpa [#allocation4], 1 }
 0x184   :  { %465 = vsyncpa [#allocation4 + $0x1], 1 }

</bundles_post_ra>
